<compile_context>
chip_gen: v7x
topology: tpu7x:2x2x1
jax: 0.10.0
libtpu: 0.0.40
codegen_flags: <defaults>
</compile_context>

<pallas_src>
import functools
from typing import NamedTuple

import jax
import jax.numpy as jnp
from jax.experimental import pallas as pl
from jax.experimental.pallas import tpu as pltpu


P_PAD = 128  # positive-sample axis padded to one full lane width


# ----------------------------------------------------------------------------
# Fused per-head kernel: box IoU/GIoU + in-kernel target map + varifocal loss.
# One grid step == one head.
# ----------------------------------------------------------------------------
def _spm_head_kernel(score_ref, pred_ref, gt_ref, bidx_ref, midx_ref, mask_ref,
                     cls_ref, reg_ref, *, iou_aware, alpha):
    eps = 1e-6

    # ---- aligned IoU + GIoU over the (lane-padded) positive samples ---------
    pb = pred_ref[0]          # (4, P_PAD) coordinate rows x1,y1,x2,y2
    gb = gt_ref[0]            # (4, P_PAD)
    valid = mask_ref[0]       # (1, P_PAD) 1.0 for real positives, 0.0 for pad

    px1, py1, px2, py2 = pb[0:1, :], pb[1:2, :], pb[2:3, :], pb[3:4, :]
    gx1, gy1, gx2, gy2 = gb[0:1, :], gb[1:2, :], gb[2:3, :], gb[3:4, :]

    ix1 = jnp.maximum(px1, gx1)
    iy1 = jnp.maximum(py1, gy1)
    ix2 = jnp.minimum(px2, gx2)
    iy2 = jnp.minimum(py2, gy2)
    inter = jnp.maximum(ix2 - ix1, 0.0) * jnp.maximum(iy2 - iy1, 0.0)
    area_p = (px2 - px1) * (py2 - py1)
    area_g = (gx2 - gx1) * (gy2 - gy1)
    union = jnp.maximum(area_p + area_g - inter, eps)   # mmdet: clamp, not +eps
    iou = inter / union                                  # (1, P_PAD)

    ex1 = jnp.minimum(px1, gx1)
    ey1 = jnp.minimum(py1, gy1)
    ex2 = jnp.maximum(px2, gx2)
    ey2 = jnp.maximum(py2, gy2)
    enclose = jnp.maximum((ex2 - ex1) * (ey2 - ey1), eps)
    giou = iou - (enclose - union) / enclose
    reg_ref[...] = jnp.sum((1.0 - giou) * valid).reshape(1, 1, 1)

    # ---- build the IoU-aware target map in VMEM (no HBM scatter) ------------
    x = score_ref[0].astype(jnp.float32)     # (N, HW) logits (widen in-kernel)
    N, HW = x.shape
    bidx = bidx_ref[0]                       # (1, P_PAD) int32, -1 on padding
    midx = midx_ref[0]                       # (P_PAD, 1) int32, -1 on padding

    # weights[n, p] = target value of positive p if it belongs to batch row n
    batch_iota = jax.lax.broadcasted_iota(jnp.int32, (N, P_PAD), 0)
    value = iou if iou_aware else jnp.ones_like(iou)     # forward-only targets
    weights = jnp.where(batch_iota == bidx, value, 0.0) * valid        # (N, P_PAD)

    # sel[p, hw] = 1 where positive p lands at flat map position hw
    col_iota = jax.lax.broadcasted_iota(jnp.int32, (P_PAD, HW), 1)
    sel = (col_iota == midx).astype(jnp.float32)                        # (P_PAD, HW)
    target = jnp.dot(weights, sel, preferred_element_type=jnp.float32)  # (N, HW)

    # ---- varifocal classification loss (shared-exp BCE-with-logits) ---------
    e = jnp.exp(-jnp.abs(x))                              # single exp
    inv = pl.reciprocal(1.0 + e, approx=True)             # cheap EUP approx
    p_sig = jnp.where(x >= 0.0, inv, e * inv)             # sigmoid(x)
    focal_w = jnp.where(target > 0.0, target, alpha * jnp.square(p_sig - target))
    bce = jnp.maximum(x, 0.0) - x * target + jnp.log1p(e)
    cls_ref[...] = jnp.sum(bce * focal_w).reshape(1, 1, 1)


def spm_head_losses(score_maps, pred_pos, gt_pos, bidx, midx, valid,
                    *, iou_aware, alpha=0.75):
    """Fused cls + reg loss sums for all heads.

    score_maps: (Hh, N, HW) logits
    pred_pos, gt_pos: (Hh, 4, P_PAD) f32 coordinate rows (xyxy)
    bidx: (Hh, 1, P_PAD) int32; midx: (Hh, P_PAD, 1) int32; valid: (Hh, 1, P_PAD) f32
    returns (cls_sums (Hh,), reg_sums (Hh,)) float32
    """
    Hh, N, HW = score_maps.shape
    kernel = functools.partial(_spm_head_kernel, iou_aware=iou_aware, alpha=alpha)
    cls_sums, reg_sums = pl.pallas_call(
        kernel,
        grid=(Hh,),
        in_specs=[
            pl.BlockSpec((1, N, HW), lambda h: (h, 0, 0)),
            pl.BlockSpec((1, 4, P_PAD), lambda h: (h, 0, 0)),
            pl.BlockSpec((1, 4, P_PAD), lambda h: (h, 0, 0)),
            pl.BlockSpec((1, 1, P_PAD), lambda h: (h, 0, 0)),
            pl.BlockSpec((1, P_PAD, 1), lambda h: (h, 0, 0)),
            pl.BlockSpec((1, 1, P_PAD), lambda h: (h, 0, 0)),
        ],
        out_specs=(
            pl.BlockSpec((1, 1, 1), lambda h: (h, 0, 0)),
            pl.BlockSpec((1, 1, 1), lambda h: (h, 0, 0)),
        ),
        out_shape=(
            jax.ShapeDtypeStruct((Hh, 1, 1), jnp.float32),
            jax.ShapeDtypeStruct((Hh, 1, 1), jnp.float32),
        ),
        compiler_params=pltpu.CompilerParams(dimension_semantics=("parallel",)),
    )(score_maps, pred_pos, gt_pos, bidx, midx, valid)
    return cls_sums[:, 0, 0], reg_sums[:, 0, 0]


# ----------------------------------------------------------------------------
# SPMTrackCriteria (JAX/Pallas port)
# ----------------------------------------------------------------------------
class CriterionOutput(NamedTuple):
    loss: jax.Array
    metrics: dict
    extra_metrics: dict


class SPMTrackCriteria:
    def __init__(self, iou_aware_classification_score, cls_loss_weight,
                 bbox_reg_loss_weight, cls_loss_display_name,
                 bbox_reg_loss_display_name, warmup_epochs):
        self.iou_aware_classification_score = iou_aware_classification_score
        self.cls_loss_weight = cls_loss_weight
        self.bbox_reg_loss_weight = bbox_reg_loss_weight
        self.cls_loss_display_name = cls_loss_display_name
        self.bbox_reg_loss_display_name = bbox_reg_loss_display_name
        self._warmup_epochs = warmup_epochs

    def __call__(self, outputs, targets):
        epoch = targets['epoch']
        num_heads = len(outputs)

        score_stack, pred_stack, gt_stack = [], [], []
        bidx_stack, midx_stack, mask_stack = [], [], []
        num_pos_list = []

        for i, output in enumerate(outputs):
            score_map = output['score_map']                      # (N, H, W)
            N, H, W = score_map.shape
            HW = H * W
            pred_boxes = output['boxes'].astype(jnp.float32).reshape(N, HW, 4)
            gt_boxes = targets[f'boxes_{i}'].astype(jnp.float32)

            b_idx = targets[f'positive_sample_batch_dim_indices_{i}']
            m_idx = targets[f'positive_sample_map_dim_indices_{i}']

            # TODO(synk): reduce_mean_ is a cross-node all-reduce mean; single-device here.
            num_pos = jnp.maximum(
                targets[f'num_positive_samples_{i}'].astype(jnp.float32), 1.0)
            num_pos_list.append(num_pos)

            if b_idx is not None:
                P = b_idx.shape[0]
                pad = P_PAD - P
                pred_pos = pred_boxes[b_idx, m_idx]              # (P, 4) gather (glue)
                gt_pos = gt_boxes[b_idx]                         # (P, 4) gather (glue)
                pred_pad = jnp.pad(pred_pos, ((0, pad), (0, 0)))
                gt_pad = jnp.pad(gt_pos, ((0, pad), (0, 0)))
                bidx_pad = jnp.pad(b_idx.astype(jnp.int32), (0, pad), constant_values=-1)
                midx_pad = jnp.pad(m_idx.astype(jnp.int32), (0, pad), constant_values=-1)
                valid = jnp.pad(jnp.ones((P,), jnp.float32), (0, pad))
            else:
                pred_pad = jnp.zeros((P_PAD, 4), jnp.float32)
                gt_pad = jnp.zeros((P_PAD, 4), jnp.float32)
                bidx_pad = jnp.full((P_PAD,), -1, jnp.int32)
                midx_pad = jnp.full((P_PAD,), -1, jnp.int32)
                valid = jnp.zeros((P_PAD,), jnp.float32)

            score_stack.append(score_map.reshape(N, HW))
            pred_stack.append(pred_pad.T)                        # (4, P_PAD)
            gt_stack.append(gt_pad.T)
            bidx_stack.append(bidx_pad.reshape(1, P_PAD))
            midx_stack.append(midx_pad.reshape(P_PAD, 1))
            mask_stack.append(valid.reshape(1, P_PAD))

        cls_sums, reg_sums = spm_head_losses(                    # single Pallas call
            jnp.stack(score_stack), jnp.stack(pred_stack), jnp.stack(gt_stack),
            jnp.stack(bidx_stack), jnp.stack(midx_stack), jnp.stack(mask_stack),
            iou_aware=self.iou_aware_classification_score)

        total_loss = jnp.float32(0.0)
        in_warmup = self._warmup_epochs > 0 and 0 <= epoch < self._warmup_epochs
        cls_losses, reg_losses, reg_ws = [], [], []
        for i in range(num_heads):
            num_pos = num_pos_list[i]
            cls_loss = cls_sums[i] / num_pos
            reg_loss = reg_sums[i] / num_pos
            if self.cls_loss_weight != 1.0:
                cls_loss = cls_loss * self.cls_loss_weight
            reg_w = self.bbox_reg_loss_weight
            if reg_w != 1.0 or in_warmup:
                if in_warmup:
                    reg_w = reg_w * 10
                reg_loss = reg_loss * reg_w
            cls_losses.append(cls_loss)
            reg_losses.append(reg_loss)
            reg_ws.append(reg_w)
            total_loss = total_loss + cls_loss + reg_loss

        # Metric extraction: ONE host sync for all heads (instead of per-head).
        host_vals = jax.device_get(jnp.stack(cls_losses + reg_losses))
        metrics, extra_metrics = {}, {}
        for i in range(num_heads):
            cls_v = float(host_vals[i])
            reg_v = float(host_vals[num_heads + i])
            metrics[f'Loss/{self.cls_loss_display_name}_{i}'] = cls_v
            metrics[f'Loss/{self.bbox_reg_loss_display_name}_{i}'] = reg_v
            extra_metrics[f'Loss/{self.cls_loss_display_name}_unscale_{i}'] = (
                cls_v / self.cls_loss_weight)
            extra_metrics[f'Loss/{self.bbox_reg_loss_display_name}_unscale_{i}'] = (
                reg_v / reg_ws[i])

        return CriterionOutput(total_loss, metrics, extra_metrics)


# ----------------------------------------------------------------------------
# Deterministic synthetic inputs + run
# ----------------------------------------------------------------------------
def _make_boxes(key, prefix_shape):
    k1, k2 = jax.random.split(key)
    xy = jax.random.uniform(k1, prefix_shape + (2,), minval=0.0, maxval=0.5)
    wh = jax.random.uniform(k2, prefix_shape + (2,), minval=0.1, maxval=0.5)
    return jnp.concatenate([xy, xy + wh], axis=-1).astype(jnp.float32)


if __name__ == "__main__":
    N, H, W = 2, 16, 16            # batch, score-map spatial dims (H*W = 256)
    P = 8                          # positive samples per head
    num_heads = 2

    key = jax.random.PRNGKey(0)
    keys = jax.random.split(key, 4 * num_heads)

    outputs, targets = [], {'epoch': 1}
    idx_sets = [
        (jnp.array([0, 0, 0, 0, 1, 1, 1, 1], jnp.int32),
         jnp.array([3, 17, 42, 100, 7, 64, 128, 255], jnp.int32)),
        (jnp.array([0, 0, 0, 1, 1, 1, 1, 1], jnp.int32),
         jnp.array([5, 33, 200, 11, 80, 130, 199, 240], jnp.int32)),
    ]
    for i in range(num_heads):
        k_s, k_b, k_g, _ = keys[4 * i:4 * i + 4]
        outputs.append({
            'score_map': jax.random.normal(k_s, (N, H, W), jnp.float32),
            'boxes': _make_boxes(k_b, (N, H * W)),
        })
        targets[f'boxes_{i}'] = _make_boxes(k_g, (N,))
        targets[f'num_positive_samples_{i}'] = jnp.array(float(P), jnp.float32)
        targets[f'positive_sample_batch_dim_indices_{i}'] = idx_sets[i][0]
        targets[f'positive_sample_map_dim_indices_{i}'] = idx_sets[i][1]

    criteria = SPMTrackCriteria(
        iou_aware_classification_score=True,
        cls_loss_weight=1.5,
        bbox_reg_loss_weight=2.0,
        cls_loss_display_name='cls',
        bbox_reg_loss_display_name='bbox_reg',
        warmup_epochs=2,
    )

    out = criteria(outputs, targets)
    jax.block_until_ready(out.loss)
    print("KERNEL_OK")
</pallas_src>

<mosaic_0001>
module attributes {stable_mosaic.version = 11 : i64} {
  func.func @_spm_head_kernel(%arg0: i32, %arg1: memref<1x2x256xf32, #tpu.memory_space<vmem>>, %arg2: memref<1x4x128xf32, #tpu.memory_space<vmem>>, %arg3: memref<1x4x128xf32, #tpu.memory_space<vmem>>, %arg4: memref<1x1x128xi32, #tpu.memory_space<vmem>>, %arg5: memref<1x128x1xi32, #tpu.memory_space<vmem>>, %arg6: memref<1x1x128xf32, #tpu.memory_space<vmem>>, %arg7: memref<1x1x1xf32, #tpu.memory_space<vmem>>, %arg8: memref<1x1x1xf32, #tpu.memory_space<vmem>>) attributes {dimension_semantics = [#tpu.dimension_semantics<parallel>], iteration_bounds = array<i64: 2>, scalar_prefetch = 0 : i64, scratch_operands = 0 : i64, tpu.core_type = #tpu.core_type<tc>, window_params = [{transform_indices = @transform_0, window_bounds = array<i64: 1, 2, 256>}, {transform_indices = @transform_1, window_bounds = array<i64: 1, 4, 128>}, {transform_indices = @transform_2, window_bounds = array<i64: 1, 4, 128>}, {transform_indices = @transform_3, window_bounds = array<i64: 1, 1, 128>}, {transform_indices = @transform_4, window_bounds = array<i64: 1, 128, 1>}, {transform_indices = @transform_5, window_bounds = array<i64: 1, 1, 128>}, {transform_indices = @transform_6, window_bounds = array<i64: 1, 1, 1>}, {transform_indices = @transform_7, window_bounds = array<i64: 1, 1, 1>}]} {
    %c0 = arith.constant 0 : index
    %c0_0 = arith.constant 0 : index
    %c0_1 = arith.constant 0 : index
    %0 = vector.load %arg2[%c0, %c0_0, %c0_1] : memref<1x4x128xf32, #tpu.memory_space<vmem>>, vector<1x4x128xf32>
    %1 = vector.shape_cast %0 : vector<1x4x128xf32> to vector<4x128xf32>
    %c0_2 = arith.constant 0 : index
    %c0_3 = arith.constant 0 : index
    %c0_4 = arith.constant 0 : index
    %2 = vector.load %arg3[%c0_2, %c0_3, %c0_4] : memref<1x4x128xf32, #tpu.memory_space<vmem>>, vector<1x4x128xf32>
    %3 = vector.shape_cast %2 : vector<1x4x128xf32> to vector<4x128xf32>
    %c0_5 = arith.constant 0 : index
    %c0_6 = arith.constant 0 : index
    %c0_7 = arith.constant 0 : index
    %4 = vector.load %arg6[%c0_5, %c0_6, %c0_7] : memref<1x1x128xf32, #tpu.memory_space<vmem>>, vector<1x1x128xf32>
    %5 = vector.shape_cast %4 : vector<1x1x128xf32> to vector<1x128xf32>
    %6 = vector.extract_strided_slice %1 {offsets = [0, 0], sizes = [1, 128], strides = [1, 1]} : vector<4x128xf32> to vector<1x128xf32>
    %7 = vector.extract_strided_slice %1 {offsets = [1, 0], sizes = [1, 128], strides = [1, 1]} : vector<4x128xf32> to vector<1x128xf32>
    %8 = vector.extract_strided_slice %1 {offsets = [2, 0], sizes = [1, 128], strides = [1, 1]} : vector<4x128xf32> to vector<1x128xf32>
    %9 = vector.extract_strided_slice %1 {offsets = [3, 0], sizes = [1, 128], strides = [1, 1]} : vector<4x128xf32> to vector<1x128xf32>
    %10 = vector.extract_strided_slice %3 {offsets = [0, 0], sizes = [1, 128], strides = [1, 1]} : vector<4x128xf32> to vector<1x128xf32>
    %11 = vector.extract_strided_slice %3 {offsets = [1, 0], sizes = [1, 128], strides = [1, 1]} : vector<4x128xf32> to vector<1x128xf32>
    %12 = vector.extract_strided_slice %3 {offsets = [2, 0], sizes = [1, 128], strides = [1, 1]} : vector<4x128xf32> to vector<1x128xf32>
    %13 = vector.extract_strided_slice %3 {offsets = [3, 0], sizes = [1, 128], strides = [1, 1]} : vector<4x128xf32> to vector<1x128xf32>
    %14 = arith.maximumf %6, %10 : vector<1x128xf32>
    %15 = arith.maximumf %7, %11 : vector<1x128xf32>
    %16 = arith.minimumf %8, %12 : vector<1x128xf32>
    %17 = arith.minimumf %9, %13 : vector<1x128xf32>
    %18 = arith.subf %16, %14 : vector<1x128xf32>
    %cst = arith.constant 0.000000e+00 : f32
    %19 = vector.broadcast %cst : f32 to vector<1x128xf32>
    %20 = arith.maximumf %18, %19 : vector<1x128xf32>
    %21 = arith.subf %17, %15 : vector<1x128xf32>
    %cst_8 = arith.constant 0.000000e+00 : f32
    %22 = vector.broadcast %cst_8 : f32 to vector<1x128xf32>
    %23 = arith.maximumf %21, %22 : vector<1x128xf32>
    %24 = arith.mulf %20, %23 : vector<1x128xf32>
    %25 = arith.subf %8, %6 : vector<1x128xf32>
    %26 = arith.subf %9, %7 : vector<1x128xf32>
    %27 = arith.mulf %25, %26 : vector<1x128xf32>
    %28 = arith.subf %12, %10 : vector<1x128xf32>
    %29 = arith.subf %13, %11 : vector<1x128xf32>
    %30 = arith.mulf %28, %29 : vector<1x128xf32>
    %31 = arith.addf %27, %30 : vector<1x128xf32>
    %32 = arith.subf %31, %24 : vector<1x128xf32>
    %cst_9 = arith.constant 9.99999997E-7 : f32
    %33 = vector.broadcast %cst_9 : f32 to vector<1x128xf32>
    %34 = arith.maximumf %32, %33 : vector<1x128xf32>
    %35 = arith.divf %24, %34 : vector<1x128xf32>
    %36 = arith.minimumf %6, %10 : vector<1x128xf32>
    %37 = arith.minimumf %7, %11 : vector<1x128xf32>
    %38 = arith.maximumf %8, %12 : vector<1x128xf32>
    %39 = arith.maximumf %9, %13 : vector<1x128xf32>
    %40 = arith.subf %38, %36 : vector<1x128xf32>
    %41 = arith.subf %39, %37 : vector<1x128xf32>
    %42 = arith.mulf %40, %41 : vector<1x128xf32>
    %cst_10 = arith.constant 9.99999997E-7 : f32
    %43 = vector.broadcast %cst_10 : f32 to vector<1x128xf32>
    %44 = arith.maximumf %42, %43 : vector<1x128xf32>
    %45 = arith.subf %44, %34 : vector<1x128xf32>
    %46 = arith.divf %45, %44 : vector<1x128xf32>
    %47 = arith.subf %35, %46 : vector<1x128xf32>
    %cst_11 = arith.constant 1.000000e+00 : f32
    %48 = vector.broadcast %cst_11 : f32 to vector<1x128xf32>
    %49 = arith.subf %48, %47 : vector<1x128xf32>
    %50 = arith.mulf %49, %5 : vector<1x128xf32>
    %51 = vector.shape_cast %50 : vector<1x128xf32> to vector<1x1x128xf32>
    %cst_12 = arith.constant dense<0.000000e+00> : vector<1xf32>
    %52 = vector.multi_reduction <add>, %51, %cst_12 [1, 2] : vector<1x1x128xf32> to vector<1xf32>
    %53 = vector.shape_cast %52 : vector<1xf32> to vector<1x1x1xf32>
    %54 = vector.extract %53[0, 0, 0] : f32 from vector<1x1x1xf32>
    %55 = vector.broadcast %54 : f32 to vector<1x1x1xf32>
    %c0_13 = arith.constant 0 : index
    %c0_14 = arith.constant 0 : index
    %c0_15 = arith.constant 0 : index
    %56 = vector.load %arg8[%c0_13, %c0_14, %c0_15] : memref<1x1x1xf32, #tpu.memory_space<vmem>>, vector<1x1x1xf32>
    tpu.vector_store %arg8[%c0_13, %c0_14, %c0_15], %55 {strides = array<i32>} : memref<1x1x1xf32, #tpu.memory_space<vmem>>, vector<1x1x1xf32>,
    %c0_16 = arith.constant 0 : index
    %c0_17 = arith.constant 0 : index
    %c0_18 = arith.constant 0 : index
    %57 = vector.load %arg1[%c0_16, %c0_17, %c0_18] : memref<1x2x256xf32, #tpu.memory_space<vmem>>, vector<1x2x256xf32>
    %58 = vector.shape_cast %57 : vector<1x2x256xf32> to vector<2x256xf32>
    %c0_19 = arith.constant 0 : index
    %c0_20 = arith.constant 0 : index
    %c0_21 = arith.constant 0 : index
    %59 = vector.load %arg4[%c0_19, %c0_20, %c0_21] : memref<1x1x128xi32, #tpu.memory_space<vmem>>, vector<1x1x128xi32>
    %60 = vector.shape_cast %59 : vector<1x1x128xi32> to vector<1x128xi32>
    %c0_22 = arith.constant 0 : index
    %c0_23 = arith.constant 0 : index
    %c0_24 = arith.constant 0 : index
    %61 = vector.load %arg5[%c0_22, %c0_23, %c0_24] : memref<1x128x1xi32, #tpu.memory_space<vmem>>, vector<1x128x1xi32>
    %62 = vector.shape_cast %61 : vector<1x128x1xi32> to vector<128x1xi32>
    %63 = tpu.iota {dimensions = array<i32: 0>} : vector<2x128xi32>
    %64 = vector.broadcast %60 : vector<1x128xi32> to vector<2x128xi32>
    %65 = arith.cmpi eq, %63, %64 : vector<2x128xi32>
    %cst_25 = arith.constant 0.000000e+00 : f32
    %66 = vector.shape_cast %35 : vector<1x128xf32> to vector<1x128xf32>
    %67 = vector.broadcast %66 : vector<1x128xf32> to vector<2x128xf32>
    %68 = vector.broadcast %cst_25 : f32 to vector<2x128xf32>
    %69 = arith.select %65, %67, %68 : vector<2x128xi1>, vector<2x128xf32>
    %70 = vector.broadcast %5 : vector<1x128xf32> to vector<2x128xf32>
    %71 = arith.mulf %69, %70 : vector<2x128xf32>
    %72 = tpu.iota {dimensions = array<i32: 1>} : vector<128x256xi32>
    %73 = vector.broadcast %62 : vector<128x1xi32> to vector<128x256xi32>
    %74 = arith.cmpi eq, %72, %73 : vector<128x256xi32>
    %75 = arith.extui %74 : vector<128x256xi1> to vector<128x256xi32>
    %76 = arith.sitofp %75 : vector<128x256xi32> to vector<128x256xf32>
    %cst_26 = arith.constant dense<0.000000e+00> : vector<2x256xf32>
    %77 = tpu.matmul %71, %76, %cst_26 {dimension_numbers = #tpu.dot_dimension_numbers<[1], [0], [0], [1], [0, 0, 1, 1], [], []>} : vector<2x128xf32>, vector<128x256xf32>, vector<2x256xf32> -> vector<2x256xf32>
    %78 = math.absf %58 : vector<2x256xf32>
    %cst_27 = arith.constant 0.000000e+00 : f32
    %79 = vector.broadcast %cst_27 : f32 to vector<2x256xf32>
    %80 = arith.subf %79, %78 : vector<2x256xf32>
    %81 = math.exp %80 : vector<2x256xf32>
    %cst_28 = arith.constant 1.000000e+00 : f32
    %82 = vector.broadcast %cst_28 : f32 to vector<2x256xf32>
    %83 = arith.addf %82, %81 : vector<2x256xf32>
    %84 = tpu.reciprocal %83 {approx = true} : vector<2x256xf32> -> vector<2x256xf32>
    %cst_29 = arith.constant 0.000000e+00 : f32
    %85 = vector.broadcast %cst_29 : f32 to vector<2x256xf32>
    %86 = arith.cmpf oge, %58, %85 : vector<2x256xf32>
    %87 = arith.mulf %81, %84 : vector<2x256xf32>
    %88 = arith.select %86, %84, %87 : vector<2x256xi1>, vector<2x256xf32>
    %cst_30 = arith.constant 0.000000e+00 : f32
    %89 = vector.broadcast %cst_30 : f32 to vector<2x256xf32>
    %90 = arith.cmpf ogt, %77, %89 : vector<2x256xf32>
    %91 = arith.subf %88, %77 : vector<2x256xf32>
    %92 = arith.mulf %91, %91 : vector<2x256xf32>
    %cst_31 = arith.constant 7.500000e-01 : f32
    %93 = vector.broadcast %cst_31 : f32 to vector<2x256xf32>
    %94 = arith.mulf %93, %92 : vector<2x256xf32>
    %95 = arith.select %90, %77, %94 : vector<2x256xi1>, vector<2x256xf32>
    %cst_32 = arith.constant 0.000000e+00 : f32
    %96 = vector.broadcast %cst_32 : f32 to vector<2x256xf32>
    %97 = arith.maximumf %58, %96 : vector<2x256xf32>
    %98 = arith.mulf %58, %77 : vector<2x256xf32>
    %99 = arith.subf %97, %98 : vector<2x256xf32>
    %100 = math.log1p %81 : vector<2x256xf32>
    %101 = arith.addf %99, %100 : vector<2x256xf32>
    %102 = arith.mulf %101, %95 : vector<2x256xf32>
    %103 = vector.shape_cast %102 : vector<2x256xf32> to vector<1x2x256xf32>
    %cst_33 = arith.constant dense<0.000000e+00> : vector<1xf32>
    %104 = vector.multi_reduction <add>, %103, %cst_33 [1, 2] : vector<1x2x256xf32> to vector<1xf32>
    %105 = vector.shape_cast %104 : vector<1xf32> to vector<1x1x1xf32>
    %106 = vector.extract %105[0, 0, 0] : f32 from vector<1x1x1xf32>
    %107 = vector.broadcast %106 : f32 to vector<1x1x1xf32>
    %c0_34 = arith.constant 0 : index
    %c0_35 = arith.constant 0 : index
    %c0_36 = arith.constant 0 : index
    %108 = vector.load %arg7[%c0_34, %c0_35, %c0_36] : memref<1x1x1xf32, #tpu.memory_space<vmem>>, vector<1x1x1xf32>
    tpu.vector_store %arg7[%c0_34, %c0_35, %c0_36], %107 {strides = array<i32>} : memref<1x1x1xf32, #tpu.memory_space<vmem>>, vector<1x1x1xf32>,
    return
  }
  func.func @transform_0(%arg0: i32) -> (i32, i32, i32) {
    %c0_i32 = arith.constant 0 : i32
    %c0_i32_0 = arith.constant 0 : i32
    %c0_i32_1 = arith.constant 0 : i32
    return %arg0, %c0_i32, %c0_i32_0 : i32, i32, i32
  }
  func.func @transform_1(%arg0: i32) -> (i32, i32, i32) {
    %c0_i32 = arith.constant 0 : i32
    %c0_i32_0 = arith.constant 0 : i32
    %c0_i32_1 = arith.constant 0 : i32
    return %arg0, %c0_i32, %c0_i32_0 : i32, i32, i32
  }
  func.func @transform_2(%arg0: i32) -> (i32, i32, i32) {
    %c0_i32 = arith.constant 0 : i32
    %c0_i32_0 = arith.constant 0 : i32
    %c0_i32_1 = arith.constant 0 : i32
    return %arg0, %c0_i32, %c0_i32_0 : i32, i32, i32
  }
  func.func @transform_3(%arg0: i32) -> (i32, i32, i32) {
    %c0_i32 = arith.constant 0 : i32
    %c0_i32_0 = arith.constant 0 : i32
    %c0_i32_1 = arith.constant 0 : i32
    return %arg0, %c0_i32, %c0_i32_0 : i32, i32, i32
  }
  func.func @transform_4(%arg0: i32) -> (i32, i32, i32) {
    %c0_i32 = arith.constant 0 : i32
    %c0_i32_0 = arith.constant 0 : i32
    %c0_i32_1 = arith.constant 0 : i32
    return %arg0, %c0_i32, %c0_i32_0 : i32, i32, i32
  }
  func.func @transform_5(%arg0: i32) -> (i32, i32, i32) {
    %c0_i32 = arith.constant 0 : i32
    %c0_i32_0 = arith.constant 0 : i32
    %c0_i32_1 = arith.constant 0 : i32
    return %arg0, %c0_i32, %c0_i32_0 : i32, i32, i32
  }
  func.func @transform_6(%arg0: i32) -> (i32, i32, i32) {
    %c0_i32 = arith.constant 0 : i32
    %c0_i32_0 = arith.constant 0 : i32
    %c0_i32_1 = arith.constant 0 : i32
    return %arg0, %c0_i32, %c0_i32_0 : i32, i32, i32
  }
  func.func @transform_7(%arg0: i32) -> (i32, i32, i32) {
    %c0_i32 = arith.constant 0 : i32
    %c0_i32_0 = arith.constant 0 : i32
    %c0_i32_1 = arith.constant 0 : i32
    return %arg0, %c0_i32, %c0_i32_0 : i32, i32, i32
  }
}

</mosaic_0001>

<bundles_post_ra>
// kernel: tpu_custom_call.1
= control target key start
LH: loop header
LB: loop body
LE: loop exit
PB: predicated region body
PF: predicated region fallthrough
CT: control target
= control target key end

     0   :  { %s1096_s24 = smov 0   ;;  %s1218_s0 = inlined_call_operand.vmem [shape: f32[2,2,256], index: 0, kind: input, shape index: {}]   ;;  %s1219_s1 = inlined_call_operand.vmem [shape: f32[2,4,128], index: 1, kind: input, shape index: {}]   ;;  %s1220_s2 = inlined_call_operand.vmem [shape: f32[2,4,128], index: 2, kind: input, shape index: {}]   ;;  %s1221_s3 = inlined_call_operand.vmem [shape: s32[2,1,128], index: 3, kind: input, shape index: {}]   ;;  %s1222_s4 = inlined_call_operand.vmem [shape: s32[2,128,1], index: 4, kind: input, shape index: {}]   ;;  %s1223_s5 = inlined_call_operand.vmem [shape: f32[2,1,128], index: 5, kind: input, shape index: {}]   ;;  %s1224_s6 = inlined_call_operand.vmem [shape: f32[2,1,1], index: 6, kind: output, shape index: {0}]   ;;  %s1225_s7 = inlined_call_operand.vmem [shape: f32[2,1,1], index: 7, kind: output, shape index: {1}]  }
   0x1 LB: > { %s903_s25 = sadd.s32 4294967295, %s1050_s24   ;;  %p907_p0 = scmp.ge.s32.totalorder %s1050_s24, 1  ;;  %s1050_s24 = sphi %s1096_s24, %s18_s24  }
   0x2   : > { %p284_p1 = scmp.lt.s32.totalorder %s1050_s24, 3 }
   0x4   : > { %p285_p2 = pnand %p907_p0, %p284_p1 }
   0x5   : > { %p336_p3 = scmp.lt.s32.totalorder (!%p285_p2), %s903_s25, 1  ;;  %v1052_v0 = vmov (!%p285_p2), 0   ;;  %v1053_v17 = vmov (!%p285_p2), 0.0   ;;  %v457_v31 = vlaneseq (!%p285_p2)  ;;  %v1054_v46 = vmov (!%p285_p2), 1.0|1.0  }
   0x6   : > { %288 = sbr.rel (%p285_p2) target bundleno = 630 (0x276), region = 44  ;;  %1033 = vset.pattern.permute.xlu1 (!%p285_p2), %v1052_v0  ;;  %1032 = vset.pattern.permute.xlu0 (!%p285_p2), %v1052_v0 }
   0x7   : > { %681 = vmatprep.mubr.f32.mxu0 (!%p285_p2), %v1053_v17  ;;  %v1127_v35 = vand.u32 (!%p285_p2), 127, %v457_v31  ;;  %v1166_v54 = vshrl.u32 (!%p285_p2), %v457_v31, 7 }
   0x9   : > { %v1132_v40 = vadd.s32 (!%p285_p2), 128, %v1127_v35  ;;  %v466_v59 = vsub.s32 (!%p285_p2), 2, %v1166_v54 }
   0xd   : > { %s1227_s25 = smov (!%p336_p3, %s903_s25), 1 }
   0xe   : > { %s983_s26 = sshll.u32 %s1227_s25, 7  ;;  %s1111_s30 = sshll.u32 %s1227_s25, 2 }
   0xf   : > { %s356_s29 = scalar_lea.vmem %s1222_s4, %s983_s26  ;;  %s344_s10 = scalar_lea.vmem %s1219_s1, %s1111_s30 }
  0x10   : > { %v443_v1 = vld [vmem:[%s356_s29 + $0x10] sm:$0xff]  ;;  %v441_v2 = vld [vmem:[%s356_s29] sm:$0xff]  ;;  %v444_v3 = vld [vmem:[%s356_s29 + $0x18] sm:$0xff]  ;;  %s348_s13 = scalar_lea.vmem %s1220_s2, %s1111_s30  ;;  %s351_s16 = scalar_lea.vmem %s1221_s3, %s1227_s25 }
  0x11   : > { %480 = vperm.xlu1 %1033, %v443_v1   ;;  %474 = vperm.xlu0 %1032, %v441_v2   ;;  %v442_v4 = vld [vmem:[%s356_s29 + $0x8] sm:$0xff]  ;;  %v445_v6 = vld [vmem:[%s356_s29 + $0x20] sm:$0xff]  ;;  %v448_v7 = vld [vmem:[%s356_s29 + $0x38] sm:$0xff]  ;;  %s359_s19 = scalar_lea.vmem %s1223_s5, %s1227_s25  ;;  %s340_s22 = scalar_lea.vmem %s1218_s0, %s1111_s30 }
  0x12   : > { %v446_v5 = vld [vmem:[%s356_s29 + $0x28] sm:$0xff]  ;;  %v447_v8 = vld [vmem:[%s356_s29 + $0x30] sm:$0xff]  ;;  %v449_v10 = vld [vmem:[%s356_s29 + $0x40] sm:$0xff]  ;;  %s365_s27 = scalar_lea.vmem %s1225_s7, %s1227_s25  ;;  %s362_s8 = scalar_lea.vmem %s1224_s6, %s1227_s25 }
  0x13   : > { %v450_v9 = vld [vmem:[%s356_s29 + $0x48] sm:$0xff]  ;;  %v452_v11 = vld [vmem:[%s356_s29 + $0x58] sm:$0xff]  ;;  %v451_v12 = vld [vmem:[%s356_s29 + $0x50] sm:$0xff] }
  0x14   : > { %v454_v13 = vld [vmem:[%s356_s29 + $0x68] sm:$0xff]  ;;  %v453_v14 = vld [vmem:[%s356_s29 + $0x60] sm:$0xff]  ;;  %v456_v15 = vld [vmem:[%s356_s29 + $0x78] sm:$0xff] }
  0x15   : > { %483 = vperm.xlu1 %1033, %v444_v3   ;;  %477 = vperm.xlu0 %1032, %v442_v4   ;;  %v455_v16 = vld [vmem:[%s356_s29 + $0x70] sm:$0xff]  ;;  %v366_v18 = vld [vmem:[%s344_s10] sm:$0xf] }
  0x16   : > { %v367_v19 = vld [vmem:[%s348_s13] sm:$0xf]  ;;  %v381_v23 = vrot.slane %v366_v18, 6 }
  0x17   : > { %v1121_v20 = vmax.f32 %v366_v18, %v367_v19  ;;  %v1123_v21 = vmin.f32 %v366_v18, %v367_v19  ;;  %v389_v24 = vrot.slane %v367_v19, 6  ;;  %v915_v62 = vld [vmem:[%s351_s16] ss:$0 sm:$0xff] }
  0x18   : > { %v383_v26 = vsub.f32 %v366_v18, %v381_v23  ;;  %v914_v0 = vld [vmem:[%s359_s19] ss:$0 sm:$0xff] }
  0x19   : > { %489 = vperm.xlu1 %1033, %v446_v5   ;;  %486 = vperm.xlu0 %1032, %v445_v6   ;;  %v372_v22 = vrot.slane %v1121_v20, 6  ;;  %v391_v27 = vsub.f32 %v367_v19, %v389_v24  ;;  %v402_v3 = vrot.slane %v1123_v21, 6 }
  0x1a   : > { %v385_v29 = vrot.slane %v383_v26, 1 }
  0x1b   : > { %v374_v25 = vsub.f32 %v1123_v21, %v372_v22  ;;  %v393_v30 = vrot.slane %v391_v27, 1  ;;  %v404_v4 = vsub.f32 %v1121_v20, %v402_v3  ;;  %v1055_v22 = vmov 1983009808  }
  0x1c   : > { %v387_v33 = vmul.f32 %v385_v29, %v383_v26  ;;  %v703_v23 = vunpack.c.l.s4 %v1055_v22 }
  0x1d   : > { %495 = vperm.xlu1 %1033, %v448_v7   ;;  %492 = vperm.xlu0 %1032, %v447_v8   ;;  %v375_v28 = vmax.f32 %v374_v25, 0.0  ;;  %v395_v34 = vmul.f32 %v393_v30, %v391_v27  ;;  %v406_v5 = vrot.slane %v404_v4, 1 }
  0x1e   : > { %v704_v25 = vunpack.c.0.s8 %v703_v23 }
  0x1f   : > { %v377_v32 = vrot.slane %v375_v28, 1  ;;  %v396_v39 = vadd.f32 %v395_v34, %v387_v33  ;;  %v408_v6 = vmul.f32 %v406_v5, %v404_v4 }
  0x21   : > { %501 = vperm.xlu1 %1033, %v450_v9   ;;  %498 = vperm.xlu0 %1032, %v449_v10   ;;  %v1129_v38 = vmul.f32 %v377_v32, %v375_v28  ;;  %v409_v7 = vmax.f32 %v408_v6, 1e-06  ;;  %v707_v28 = vsub.s32 %v704_v25, %v1166_v54 }
  0x23   : > { %v397_v43 = vsub.f32 %v396_v39, %v1129_v38 }
  0x25   : > { %507 = vperm.xlu1 %1033, %v452_v11   ;;  %504 = vperm.xlu0 %1032, %v451_v12   ;;  %v1142_v47 = vmax.f32 %v397_v43, 1e-06 }
  0x27   : > { %1034 = vrcp.f32 %v1142_v47  ;;  %v410_v8 = vsub.f32 %v409_v7, %v1142_v47 }
  0x28   : > { %1036 = vrcp.f32 %v409_v7 }
  0x29   : > { %513 = vperm.xlu1 %1033, %v454_v13   ;;  %510 = vperm.xlu0 %1032, %v453_v14  }
  0x2d   : > { %519 = vperm.xlu1 %1033, %v456_v15   ;;  %516 = vperm.xlu0 %1032, %v455_v16   ;;  %v439_v16 = vld [vmem:[%s340_s22] sm:$0xf] }
  0x2e   : > { %v688_v17 = vand.u32 2147483647, %v439_v16 }
  0x30   : > { %v689_v18 = vsub.f32 0.0, %v688_v17 }
  0x31   : > { %v1035_v55 = vpop.eup %1034 }
  0x32   : > { %v400_v58 = vmul.f32 %v1035_v55, %v1129_v38  ;;  %v1037_v9 = vpop.eup %1036  ;;  %v690_v19 = vmul.f32 1.442695, %v689_v18 }
  0x33   : > { %v412_v10 = vmul.f32 %v1037_v9, %v410_v8 }
  0x34   : > { %v467_v63 = vrot.slane %v400_v58, %v466_v59  ;;  %1038 = vpow2.f32 %v690_v19 }
  0x35   : > { %v413_v11 = vsub.f32 %v400_v58, %v412_v10 }
  0x37   : > { %v414_v12 = vsub.f32 1.0, %v413_v11 }
  0x39   : > { %v421_v13 = vmul.f32 %v914_v0, %v414_v12 }
  0x3b   : > { %v423_v14 = vrot.slane %v421_v13, 2 }
  0x3e   : > { %v1039_v20 = vpop.eup %1038 }
  0x3f   : > { %v692_v21 = vadd.f32 1.0, %v1039_v20  ;;  %v732_v33 = vmul.f32 -0.5, %v1039_v20  ;;  %v735_v38 = vand.u32 2147483647, %v1039_v20 }
  0x41   : > { %1040 = vrcp.f32 %v692_v21 }
  0x42   : > { %1042 = vlog2.f32 %v692_v21 }
  0x4b   : > { %v1041_v24 = vpop.eup %1040 }
  0x4c   : > { %v695_v26 = vmul.f32 %v1041_v24, %v1039_v20 }
  0x90   : > { %v481_v36 = vpop.permute.xlu1 %480  ;;  %v475_v37 = vpop.permute.xlu0 %474 }
  0x91   : > { %vm526_vm2 = vcmp.eq.s32.totalorder %v1132_v40, %v481_v36  ;;  %vm522_vm4 = vcmp.eq.s32.totalorder %v1132_v40, %v475_v37  ;;  %vm521_vm5 = vcmp.eq.s32.totalorder %v1127_v35, %v475_v37  ;;  %vm525_vm8 = vcmp.eq.s32.totalorder %v1127_v35, %v481_v36  ;;  %v1043_v37 = vpop.eup %1042 }
  0x92   : > { %v733_v36 = vadd.f32 1.0, %v732_v33  ;;  %v731_v43 = vmul.f32 0.6931472, %v1043_v37 }
  0x94   : > { %v484_v41 = vpop.permute.xlu1 %483  ;;  %v478_v42 = vpop.permute.xlu0 %477 }
  0x95   : > { %vm524_vm0 = vcmp.eq.s32.totalorder %v1132_v40, %v478_v42  ;;  %vm523_vm1 = vcmp.eq.s32.totalorder %v1127_v35, %v478_v42  ;;  %vm528_vm3 = vcmp.eq.s32.totalorder %v1132_v40, %v484_v41  ;;  %vm527_vm9 = vcmp.eq.s32.totalorder %v1127_v35, %v484_v41 }
  0x96   : > { %vm984_vm6 = vmpackc.low %vm524_vm0, %vm522_vm4 }
  0x97   : > { %985 = vmatprep.subr.msk.bf16.mxu0 %vm984_vm6, %v1054_v46  ;;  %vm986_vm7 = vmpackc.low %vm523_vm1, %vm521_vm5 }
  0x98   : > { %v490_v44 = vpop.permute.xlu1 %489  ;;  %v487_v45 = vpop.permute.xlu0 %486  ;;  %vm988_vm10 = vmpackc.low %vm528_vm3, %vm526_vm2  ;;  %987 = vmatpush1.bf16.msk.msra.mxu0 %vm986_vm7, %v1054_v46 }
  0x99   : > { %vm532_vm11 = vcmp.eq.s32.totalorder %v1132_v40, %v490_v44  ;;  %vm530_vm12 = vcmp.eq.s32.totalorder %v1132_v40, %v487_v45  ;;  %989 = vmatprep.subr.msk.bf16.mxu0 %vm988_vm10, %v1054_v46  ;;  %vm990_vm13 = vmpackc.low %vm527_vm9, %vm525_vm8  ;;  %vm531_vm14 = vcmp.eq.s32.totalorder %v1127_v35, %v490_v44  ;;  %vm529_vm15 = vcmp.eq.s32.totalorder %v1127_v35, %v487_v45 }
  0x9a   : > { %vm992_vm0 = vmpackc.low %vm532_vm11, %vm530_vm12  ;;  %v734_v44 = vmul.f32 %v1039_v20, %v733_v36 }
  0x9b   : > { %vm994_vm3 = vmpackc.low %vm531_vm14, %vm529_vm15 }
  0x9c   : > { %v496_v48 = vpop.permute.xlu1 %495  ;;  %v493_v49 = vpop.permute.xlu0 %492  ;;  %991 = vmatpush1.bf16.msk.msra.mxu0 %vm990_vm13, %v1054_v46 }
  0x9d   : > { %vm536_vm1 = vcmp.eq.s32.totalorder %v1132_v40, %v496_v48  ;;  %vm534_vm2 = vcmp.eq.s32.totalorder %v1132_v40, %v493_v49  ;;  %993 = vmatprep.subr.msk.bf16.mxu0 %vm992_vm0, %v1054_v46  ;;  %vm535_vm4 = vcmp.eq.s32.totalorder %v1127_v35, %v496_v48  ;;  %vm533_vm5 = vcmp.eq.s32.totalorder %v1127_v35, %v493_v49 }
  0x9e   : > { %vm996_vm6 = vmpackc.low %vm536_vm1, %vm534_vm2 }
  0x9f   : > { %vm998_vm9 = vmpackc.low %vm535_vm4, %vm533_vm5 }
  0xa0   : > { %v502_v50 = vpop.permute.xlu1 %501  ;;  %v499_v51 = vpop.permute.xlu0 %498  ;;  %995 = vmatpush1.bf16.msk.msra.mxu0 %vm994_vm3, %v1054_v46 }
  0xa1   : > { %vm540_vm7 = vcmp.eq.s32.totalorder %v1132_v40, %v502_v50  ;;  %vm538_vm8 = vcmp.eq.s32.totalorder %v1132_v40, %v499_v51  ;;  %997 = vmatprep.subr.msk.bf16.mxu0 %vm996_vm6, %v1054_v46  ;;  %vm539_vm10 = vcmp.eq.s32.totalorder %v1127_v35, %v502_v50  ;;  %vm537_vm11 = vcmp.eq.s32.totalorder %v1127_v35, %v499_v51 }
  0xa2   : > { %vm1000_vm12 = vmpackc.low %vm540_vm7, %vm538_vm8 }
  0xa3   : > { %vm1002_vm15 = vmpackc.low %vm539_vm10, %vm537_vm11  ;;  %vm463_vm11 = vcmp.eq.s32.totalorder %v1166_v54, %v915_v62 }
  0xa4   : > { %v508_v52 = vpop.permute.xlu1 %507  ;;  %v505_v53 = vpop.permute.xlu0 %504  ;;  %999 = vmatpush1.bf16.msk.msra.mxu0 %vm998_vm9, %v1054_v46  ;;  %v468_v1 = vsel %vm463_vm11, %v467_v63, 0.0 }
  0xa5   : > { %vm544_vm13 = vcmp.eq.s32.totalorder %v1132_v40, %v508_v52  ;;  %vm542_vm14 = vcmp.eq.s32.totalorder %v1132_v40, %v505_v53  ;;  %1001 = vmatprep.subr.msk.bf16.mxu0 %vm1000_vm12, %v1054_v46  ;;  %vm543_vm0 = vcmp.eq.s32.totalorder %v1127_v35, %v508_v52  ;;  %vm541_vm1 = vcmp.eq.s32.totalorder %v1127_v35, %v505_v53 }
  0xa6   : > { %vm1004_vm2 = vmpackc.low %vm544_vm13, %vm542_vm14  ;;  %v469_v2 = vmul.f32 %v914_v0, %v468_v1 }
  0xa7   : > { %vm1006_vm5 = vmpackc.low %vm543_vm0, %vm541_vm1  ;;  %vm425_vm1 = vcmask 1040384  }
  0xa8   : > { %v514_v56 = vpop.permute.xlu1 %513  ;;  %v511_v57 = vpop.permute.xlu0 %510  ;;  %1003 = vmatpush1.bf16.msk.msra.mxu0 %vm1002_vm15, %v1054_v46  ;;  %v426_v15 = vsel %vm425_vm1, %v423_v14, 0.0 }
  0xa9   : > { %vm548_vm3 = vcmp.eq.s32.totalorder %v1132_v40, %v514_v56  ;;  %vm546_vm4 = vcmp.eq.s32.totalorder %v1132_v40, %v511_v57  ;;  %1005 = vmatprep.subr.msk.bf16.mxu0 %vm1004_vm2, %v1054_v46  ;;  %vm547_vm6 = vcmp.eq.s32.totalorder %v1127_v35, %v514_v56  ;;  %vm545_vm7 = vcmp.eq.s32.totalorder %v1127_v35, %v511_v57 }
  0xaa   : > { %vm1008_vm8 = vmpackc.low %vm548_vm3, %vm546_vm4  ;;  %427 = vadd.xlane.f32.xlu0 %v426_v15  ;;  %vm694_vm2 = vcmp.ge.f32.partialorder %v439_v16, 0.0  ;;  %vm736_vm4 = vcmp.lt.f32.partialorder %v735_v38, 0.0004427343 }
  0xab   : > { %vm1010_vm12 = vmpackc.low %vm547_vm6, %vm545_vm7  ;;  %v696_v31 = vsel %vm694_vm2, %v1041_v24, %v695_v26  ;;  %v737_v49 = vsel %vm736_vm4, %v734_v44, %v731_v43  ;;  %vm762_vm6 = vcmask 1041408   ;;  %vm437_vm7 = vcmask 0  }
  0xac   : > { %v520_v60 = vpop.permute.xlu1 %519  ;;  %v517_v61 = vpop.permute.xlu0 %516  ;;  %1007 = vmatpush1.bf16.msk.msra.mxu0 %vm1006_vm5, %v1054_v46 }
  0xad   : > { %vm552_vm9 = vcmp.eq.s32.totalorder %v1132_v40, %v520_v60  ;;  %vm550_vm10 = vcmp.eq.s32.totalorder %v1132_v40, %v517_v61  ;;  %1009 = vmatprep.subr.msk.bf16.mxu0 %vm1008_vm8, %v1054_v46  ;;  %vm551_vm13 = vcmp.eq.s32.totalorder %v1127_v35, %v520_v60  ;;  %vm549_vm14 = vcmp.eq.s32.totalorder %v1127_v35, %v517_v61 }
  0xae   : > { %vm1012_vm15 = vmpackc.low %vm552_vm9, %vm550_vm10  ;;  %v726_v40 = vmax.f32 %v439_v16, 0.0 }
  0xaf   : > { %vm1014_vm0 = vmpackc.low %vm551_vm13, %vm549_vm14 }
  0xb0   : > { %1011 = vmatpush1.bf16.msk.msra.mxu0 %vm1010_vm12, %v1054_v46 }
  0xb1   : > { %1013 = vmatprep.subr.msk.bf16.mxu0 %vm1012_vm15, %v1054_v46 }
  0xb4   : > { %1015 = vmatpush1.bf16.msk.msra.mxu0 %vm1014_vm0, %v1054_v46 }
  0xb7   : > { %682 = vmatmul.mubr.f32.vlgmr.msra.gmra.mrb[0].mxu0 %v469_v2 }
 0x137   : > { %v428_v59 = vpop.xlane.xlu0 %427 }
 0x138   : > { %v429_v60 = vrot.slane %v428_v59, 4 }
 0x13a   : > { %v430_v61 = vadd.f32 %v429_v60, %v428_v59 }
 0x13c   : > { %v431_v62 = vrot.slane %v430_v61, 2 }
 0x13e   : > { %v432_v63 = vadd.f32 %v431_v62, %v430_v61 }
 0x140   : > { %v433_v0 = vrot.slane %v432_v63, 1 }
 0x142   : > { %v434_v1 = vadd.f32 %v433_v0, %v432_v63 }
 0x144   : > { %1016 = vpush %v434_v1 }
 0x175   : > { %s1017_s28 = spop %1016 }
 0x176   : > { %v436_v2 = vstv %s1017_s28 }
 0x177   : > { %438 = vst.msk [vmem:[%s365_s27] sm:$0x1] %vm437_vm7, %v436_v2 }
 0x18a   : > { %v683_v27 = vpop.f32.mrb[0].mxu0 }
 0x18b   : > { %v685_v29 = vpop.f32.mrb[1].mxu0  ;;  %vm697_vm3 = vcmp.gt.f32.partialorder %v683_v27, 0.0 }
 0x18c   : > { %v701_v30 = vcombine.low %v683_v27, %v685_v29  ;;  %vm698_vm5 = vcmp.gt.f32.partialorder %v685_v29, 0.0 }
 0x18e   : > { %v708_v32 = vrot.slane %v701_v30, %v707_v28 }
 0x190   : > { %v710_v34 = vsub.f32 %v696_v31, %v708_v32  ;;  %v727_v41 = vmul.f32 %v708_v32, %v439_v16 }
 0x192   : > { %v711_v35 = vmul.f32 %v710_v34, %v710_v34  ;;  %v728_v47 = vsub.f32 %v726_v40, %v727_v41 }
 0x194   : > { %v712_v39 = vmul.f32 0.75, %v711_v35  ;;  %v738_v52 = vadd.f32 %v737_v49, %v728_v47 }
 0x196   : > { %v720_v42 = vrot.slane %v712_v39, %v707_v28 }
 0x198   : > { %v721_v45 = vcombine.high %v720_v42, %v720_v42  ;;  %v724_v46 = vsel %vm697_vm3, %v683_v27, %v720_v42 }
 0x19a   : > { %v725_v48 = vsel %vm698_vm5, %v685_v29, %v721_v45 }
 0x19b   : > { %v741_v50 = vcombine.low %v724_v46, %v725_v48 }
 0x19d   : > { %v748_v51 = vrot.slane %v741_v50, %v707_v28 }
 0x19f   : > { %v750_v53 = vmul.f32 %v748_v51, %v738_v52 }
 0x1a1   : > { %v758_v54 = vrot.slane %v750_v53, %v707_v28 }
 0x1a3   : > { %v759_v55 = vcombine.high %v758_v54, %v758_v54  ;;  %v763_v56 = vsel %vm762_vm6, %v758_v54, 0.0 }
 0x1a5   : > { %v764_v57 = vsel %vm762_vm6, %v759_v55, 0.0 }
 0x1a6   : > { %v765_v58 = vadd.f32 %v764_v57, %v763_v56 }
 0x1a8   : > { %766 = vadd.xlane.f32.xlu1 %v765_v58 }
 0x235   : > { %v767_v3 = vpop.xlane.xlu1 %766 }
 0x236   : > { %v768_v4 = vrot.slane %v767_v3, 4 }
 0x238   : > { %v769_v5 = vadd.f32 %v768_v4, %v767_v3 }
 0x23a   : > { %v770_v6 = vrot.slane %v769_v5, 2 }
 0x23c   : > { %v771_v7 = vadd.f32 %v770_v6, %v769_v5 }
 0x23e   : > { %v772_v8 = vrot.slane %v771_v7, 1 }
 0x240   : > { %v773_v9 = vadd.f32 %v772_v8, %v771_v7 }
 0x242   : > { %1018 = vpush %v773_v9 }
 0x273   : > { %s1019_s9 = spop %1018 }
 0x274   : > { %v775_v10 = vstv %s1019_s9 }
 0x275   : > { %776 = vst.msk [vmem:[%s362_s8] sm:$0x1] %vm437_vm7, %v775_v10 }
 0x276 PF: > { %s18_s24 = sadd.s32 1, %s1050_s24  }
 0x277   : > { %p15_p4 = scmp.ge.s32.totalorder %s18_s24, 4  }
 0x279   :  { %17 = sbr.rel (!%p15_p4) target bundleno = 1 (0x1), region = 101 }

</bundles_post_ra>
